<compile_context>
chip_gen: v7x
topology: tpu7x:2x2x1
jax: 0.10.0
libtpu: 0.0.40
codegen_flags: <defaults>
</compile_context>

<pallas_src>
import math
import functools

import jax
import jax.numpy as jnp
from jax import lax
from jax.experimental import pallas as pl
from jax.experimental.pallas import tpu as pltpu


# ----------------------------------------------------------------------------
# Fused kernel: one batch element per grid step, everything resident in VMEM.
# ----------------------------------------------------------------------------
def _mha_fused_kernel(x_ref, w_ref, b_ref, ctx_ref, k_ref, v_ref, *opt_refs,
                      num_heads, head_dim, with_probs):
    H = num_heads * head_dim
    matmul_dtype = w_ref.dtype                       # weights pre-cast in wrapper

    x = x_ref[0]                                     # (S, H)
    # Fused Q/K/V projection: (S, H) @ (H, 3H) + (1, 3H); f32 accumulation.
    # 1/sqrt(D) is already folded into the Q columns of W and b.
    qkv = (
        jnp.dot(x.astype(matmul_dtype), w_ref[...],
                preferred_element_type=jnp.float32)
        + b_ref[...]
    )                                                # (S, 3H) f32

    # past_key_value writeback: lane-dense full-width stores (B, S, H) layout.
    # The (B, nH, S, D) permute happens in the wrapper (XLA layout plumbing).
    k_ref[0] = qkv[:, H:2 * H]
    v_ref[0] = qkv[:, 2 * H:3 * H]

    p_ref = opt_refs[0] if with_probs else None

    # Unrolled in-kernel head loop: only 2-D matmuls and static lane slices.
    ctx_heads = []
    for h in range(num_heads):
        lo = h * head_dim
        hi = lo + head_dim
        qh = qkv[:, lo:hi]                           # scale already folded in
        kh = qkv[:, H + lo:H + hi]                   # (S, D)
        vh = qkv[:, 2 * H + lo:2 * H + hi]           # (S, D)

        # scores = Q K^T : contract last dims directly, no explicit transpose.
        s = lax.dot_general(qh.astype(matmul_dtype), kh.astype(matmul_dtype),
                            dimension_numbers=(((1,), (1,)), ((), ())),
                            preferred_element_type=jnp.float32)     # (S, S)

        # numerically stable softmax (f32); divide goes to the EUP reciprocal.
        # TODO(synk): on v6e/v7x compute exp in bf16 after the max-subtraction
        # (EUP bf16 ~2x throughput); kept f32 here for v5e and exactness.
        s = s - jnp.max(s, axis=-1, keepdims=True)
        e = jnp.exp(s)
        p = e * pl.reciprocal(jnp.sum(e, axis=-1, keepdims=True), approx=True)

        if with_probs:
            p_ref[0, h] = p.astype(p_ref.dtype)

        ctx_heads.append(
            lax.dot_general(p.astype(matmul_dtype), vh.astype(matmul_dtype),
                            dimension_numbers=(((1,), (0,)), ((), ())),
                            preferred_element_type=jnp.float32))    # (S, D)

    # ONE unmasked full-width store of the merged heads.
    ctx_ref[0] = jnp.concatenate(ctx_heads, axis=-1)                # (S, H)


def mha_forward(x, wqkv, bqkv, *, num_heads, head_dim, output_attentions,
                probs_dtype=jnp.float32):
    """x: [B, S, H] f32; wqkv: [H, 3H] (bf16 or f32, scale folded into Q cols);
    bqkv: [3H] f32. Returns ctx [B,S,H], K/V slabs [B,S,H], optional probs."""
    B, S, H = x.shape
    assert H == num_heads * head_dim
    bqkv2d = bqkv.reshape(1, 3 * H).astype(jnp.float32)

    kernel = functools.partial(
        _mha_fused_kernel,
        num_heads=num_heads, head_dim=head_dim,
        with_probs=output_attentions)

    in_specs = [
        pl.BlockSpec((1, S, H), lambda b: (b, 0, 0)),          # x (per batch)
        pl.BlockSpec((H, 3 * H), lambda b: (0, 0)),            # wqkv (shared)
        pl.BlockSpec((1, 3 * H), lambda b: (0, 0)),            # bqkv (shared)
    ]
    out_specs = [
        pl.BlockSpec((1, S, H), lambda b: (b, 0, 0)),          # context (lane-dense)
        pl.BlockSpec((1, S, H), lambda b: (b, 0, 0)),          # key slab (lane-dense)
        pl.BlockSpec((1, S, H), lambda b: (b, 0, 0)),          # value slab (lane-dense)
    ]
    out_shape = [
        jax.ShapeDtypeStruct((B, S, H), jnp.float32),
        jax.ShapeDtypeStruct((B, S, H), jnp.float32),
        jax.ShapeDtypeStruct((B, S, H), jnp.float32),
    ]
    if output_attentions:
        out_specs.append(
            pl.BlockSpec((1, num_heads, S, S), lambda b: (b, 0, 0, 0)))
        out_shape.append(
            jax.ShapeDtypeStruct((B, num_heads, S, S), probs_dtype))

    return pl.pallas_call(
        kernel,
        grid=(B,),
        in_specs=in_specs,
        out_specs=tuple(out_specs),
        out_shape=tuple(out_shape),
        compiler_params=pltpu.CompilerParams(
            dimension_semantics=("parallel",),
            # explicit scoped-VMEM budget; re-derive / KV-tile for v7x (64 MiB
            # physical) at long sequence lengths.
            vmem_limit_bytes=64 * 1024 * 1024),
    )(x, wqkv, bqkv2d)


# ----------------------------------------------------------------------------
# Module wrapper
# ----------------------------------------------------------------------------
class MultiHeadAttentionPallas:
    def __init__(self, hidden_size, num_heads, key,
                 matmul_dtype=jnp.bfloat16, probs_dtype=jnp.float32):
        # matmul_dtype=bf16 is MXU-native on v5e/v6e/v7x; softmax and all
        # accumulation stay f32. Set matmul_dtype=jnp.float32 for exact math.
        assert hidden_size % num_heads == 0
        self.hidden_size = hidden_size
        self.num_heads = num_heads
        self.head_dim = hidden_size // num_heads
        self.matmul_dtype = matmul_dtype
        self.probs_dtype = probs_dtype

        k = jax.random.split(key, 6)
        scale = 1.0 / math.sqrt(hidden_size)
        # weights stored as [in, out] so that y = x @ W + b  (f32 masters)
        self.wq = jax.random.uniform(k[0], (hidden_size, hidden_size), jnp.float32, -scale, scale)
        self.bq = jax.random.uniform(k[1], (hidden_size,), jnp.float32, -scale, scale)
        self.wk = jax.random.uniform(k[2], (hidden_size, hidden_size), jnp.float32, -scale, scale)
        self.bk = jax.random.uniform(k[3], (hidden_size,), jnp.float32, -scale, scale)
        self.wv = jax.random.uniform(k[4], (hidden_size, hidden_size), jnp.float32, -scale, scale)
        self.bv = jax.random.uniform(k[5], (hidden_size,), jnp.float32, -scale, scale)

        # Fused projection parameters with 1/sqrt(head_dim) folded into the Q
        # columns (constant fold: removes all in-kernel scale multiplies).
        attn_scale = 1.0 / math.sqrt(self.head_dim)
        self.wqkv = jnp.concatenate(
            [self.wq * attn_scale, self.wk, self.wv], axis=1).astype(matmul_dtype)  # [H, 3H]
        self.bqkv = jnp.concatenate(
            [self.bq * attn_scale, self.bk, self.bv], axis=0)                       # [3H] f32

    def __call__(self, hidden_states, output_attentions=False):
        # TODO(synk): relative_key / relative_key_query position embeddings,
        # attention_mask, head_mask, cross-attention / KV-cache concat and
        # training-mode dropout are not implemented (eval-mode self-attention only).
        B, S, H = hidden_states.shape
        outs = mha_forward(
            hidden_states, self.wqkv, self.bqkv,
            num_heads=self.num_heads, head_dim=self.head_dim,
            output_attentions=output_attentions,
            probs_dtype=self.probs_dtype)

        def to_heads(t):  # (B, S, H) -> (B, nH, S, D)  (wrapper-side layout)
            return jnp.transpose(
                t.reshape(B, S, self.num_heads, self.head_dim), (0, 2, 1, 3))

        if output_attentions:
            context_layer, key_slab, value_slab, probs = outs
            return (context_layer, probs, (to_heads(key_slab), to_heads(value_slab)))
        context_layer, key_slab, value_slab = outs
        return (context_layer, (to_heads(key_slab), to_heads(value_slab)))


# ----------------------------------------------------------------------------
# Pure-JAX reference for correctness check (f32 weights)
# ----------------------------------------------------------------------------
def reference_forward(mod, x):
    B, S, H = x.shape
    q = x.reshape(B * S, H) @ mod.wq + mod.bq
    k = x.reshape(B * S, H) @ mod.wk + mod.bk
    v = x.reshape(B * S, H) @ mod.wv + mod.bv

    def split(t):
        return jnp.transpose(t.reshape(B, S, mod.num_heads, mod.head_dim), (0, 2, 1, 3))

    qh, kh, vh = split(q), split(k), split(v)
    scores = jnp.einsum("bhld,bhrd->bhlr", qh, kh) / math.sqrt(mod.head_dim)
    probs = jax.nn.softmax(scores, axis=-1)
    ctx = jnp.einsum("bhlr,bhrd->bhld", probs, vh)
    ctx = jnp.transpose(ctx, (0, 2, 1, 3)).reshape(B, S, H)
    return ctx, probs, kh, vh


if __name__ == "__main__":
    # config: hidden_size=32, num_attention_heads=4, attention_probs_dropout_prob=0.0,
    # position_embedding_type="absolute", self-attention (no cross-attn, no cache)
    # NOTE: this toy size is one padded vreg per step — per-step overhead
    # dominates; benchmark at realistic S/H for performance conclusions.
    B, S, H, NH = 2, 8, 32, 4

    key = jax.random.PRNGKey(0)
    k_param, k_inp = jax.random.split(key)
    mod = MultiHeadAttentionPallas(H, NH, k_param)   # bf16 MXU operands by default

    x = jax.random.normal(k_inp, (B, S, H), jnp.float32)

    # variant with attention probs
    context, attn_probs, past_kv = mod(x, output_attentions=True)
    (context, attn_probs, past_kv) = jax.block_until_ready(
        (context, attn_probs, past_kv))

    # variant without attention probs (no probs allocation / writeback)
    context2, past_kv2 = mod(x, output_attentions=False)
    (context2, past_kv2) = jax.block_until_ready((context2, past_kv2))

    ref_ctx, ref_probs, ref_k, ref_v = reference_forward(mod, x)

    assert context.shape == (B, S, H)
    assert attn_probs.shape == (B, NH, S, S)
    assert past_kv[0].shape == (B, NH, S, H // NH)
    assert past_kv[1].shape == (B, NH, S, H // NH)

    # bf16 MXU operands -> ~1e-2 relative tolerance vs. the f32 reference.
    TOL = dict(rtol=2e-2, atol=2e-2)
    assert jnp.allclose(context, ref_ctx, **TOL)
    assert jnp.allclose(attn_probs.astype(jnp.float32), ref_probs, **TOL)
    assert jnp.allclose(past_kv[0], ref_k, **TOL)
    assert jnp.allclose(past_kv[1], ref_v, **TOL)
    assert jnp.allclose(context2, ref_ctx, **TOL)
    assert jnp.allclose(past_kv2[0], ref_k, **TOL)
    assert jnp.allclose(past_kv2[1], ref_v, **TOL)

    print("KERNEL_OK")
</pallas_src>

<mosaic_0001>
module attributes {stable_mosaic.version = 11 : i64} {
  func.func @_mha_fused_kernel(%arg0: i32, %arg1: memref<1x8x32xf32, #tpu.memory_space<vmem>>, %arg2: memref<32x96xbf16, #tpu.memory_space<vmem>>, %arg3: memref<1x96xf32, #tpu.memory_space<vmem>>, %arg4: memref<1x8x32xf32, #tpu.memory_space<vmem>>, %arg5: memref<1x8x32xf32, #tpu.memory_space<vmem>>, %arg6: memref<1x8x32xf32, #tpu.memory_space<vmem>>, %arg7: memref<1x4x8x8xf32, #tpu.memory_space<vmem>>) attributes {dimension_semantics = [#tpu.dimension_semantics<parallel>], iteration_bounds = array<i64: 2>, scalar_prefetch = 0 : i64, scratch_operands = 0 : i64, tpu.core_type = #tpu.core_type<tc>, window_params = [{transform_indices = @transform_0, window_bounds = array<i64: 1, 8, 32>}, {pipeline_mode = #tpu.pipeline_mode<synchronous>, transform_indices = @transform_1, window_bounds = array<i64: 32, 96>}, {pipeline_mode = #tpu.pipeline_mode<synchronous>, transform_indices = @transform_2, window_bounds = array<i64: 1, 96>}, {transform_indices = @transform_3, window_bounds = array<i64: 1, 8, 32>}, {transform_indices = @transform_4, window_bounds = array<i64: 1, 8, 32>}, {transform_indices = @transform_5, window_bounds = array<i64: 1, 8, 32>}, {transform_indices = @transform_6, window_bounds = array<i64: 1, 4, 8, 8>}]} {
    %c0 = arith.constant 0 : index
    %c0_0 = arith.constant 0 : index
    %c0_1 = arith.constant 0 : index
    %0 = vector.load %arg1[%c0, %c0_0, %c0_1] : memref<1x8x32xf32, #tpu.memory_space<vmem>>, vector<1x8x32xf32>
    %1 = vector.shape_cast %0 : vector<1x8x32xf32> to vector<8x32xf32>
    %2 = arith.truncf %1 : vector<8x32xf32> to vector<8x32xbf16>
    %c0_2 = arith.constant 0 : index
    %c0_3 = arith.constant 0 : index
    %3 = vector.load %arg2[%c0_2, %c0_3] : memref<32x96xbf16, #tpu.memory_space<vmem>>, vector<32x96xbf16>
    %cst = arith.constant dense<0.000000e+00> : vector<8x96xf32>
    %4 = tpu.matmul %2, %3, %cst {dimension_numbers = #tpu.dot_dimension_numbers<[1], [0], [0], [1], [0, 0, 1, 1], [], []>} : vector<8x32xbf16>, vector<32x96xbf16>, vector<8x96xf32> -> vector<8x96xf32>
    %c0_4 = arith.constant 0 : index
    %c0_5 = arith.constant 0 : index
    %5 = vector.load %arg3[%c0_4, %c0_5] : memref<1x96xf32, #tpu.memory_space<vmem>>, vector<1x96xf32>
    %6 = vector.broadcast %5 : vector<1x96xf32> to vector<8x96xf32>
    %7 = arith.addf %4, %6 : vector<8x96xf32>
    %8 = vector.extract_strided_slice %7 {offsets = [0, 32], sizes = [8, 32], strides = [1, 1]} : vector<8x96xf32> to vector<8x32xf32>
    %c0_6 = arith.constant 0 : index
    %c0_7 = arith.constant 0 : index
    %c0_8 = arith.constant 0 : index
    %9 = vector.load %arg5[%c0_6, %c0_7, %c0_8] : memref<1x8x32xf32, #tpu.memory_space<vmem>>, vector<1x8x32xf32>
    %10 = vector.shape_cast %9 : vector<1x8x32xf32> to vector<8x32xf32>
    %11 = vector.shape_cast %8 : vector<8x32xf32> to vector<1x8x32xf32>
    tpu.vector_store %arg5[%c0_6, %c0_7, %c0_8], %11 {strides = array<i32>} : memref<1x8x32xf32, #tpu.memory_space<vmem>>, vector<1x8x32xf32>,
    %12 = vector.extract_strided_slice %7 {offsets = [0, 64], sizes = [8, 32], strides = [1, 1]} : vector<8x96xf32> to vector<8x32xf32>
    %c0_9 = arith.constant 0 : index
    %c0_10 = arith.constant 0 : index
    %c0_11 = arith.constant 0 : index
    %13 = vector.load %arg6[%c0_9, %c0_10, %c0_11] : memref<1x8x32xf32, #tpu.memory_space<vmem>>, vector<1x8x32xf32>
    %14 = vector.shape_cast %13 : vector<1x8x32xf32> to vector<8x32xf32>
    %15 = vector.shape_cast %12 : vector<8x32xf32> to vector<1x8x32xf32>
    tpu.vector_store %arg6[%c0_9, %c0_10, %c0_11], %15 {strides = array<i32>} : memref<1x8x32xf32, #tpu.memory_space<vmem>>, vector<1x8x32xf32>,
    %16 = vector.extract_strided_slice %7 {offsets = [0, 0], sizes = [8, 8], strides = [1, 1]} : vector<8x96xf32> to vector<8x8xf32>
    %17 = vector.extract_strided_slice %7 {offsets = [0, 32], sizes = [8, 8], strides = [1, 1]} : vector<8x96xf32> to vector<8x8xf32>
    %18 = vector.extract_strided_slice %7 {offsets = [0, 64], sizes = [8, 8], strides = [1, 1]} : vector<8x96xf32> to vector<8x8xf32>
    %19 = arith.truncf %16 : vector<8x8xf32> to vector<8x8xbf16>
    %20 = arith.truncf %17 : vector<8x8xf32> to vector<8x8xbf16>
    %cst_12 = arith.constant dense<0.000000e+00> : vector<8x8xf32>
    %21 = tpu.matmul %19, %20, %cst_12 {dimension_numbers = #tpu.dot_dimension_numbers<[1], [1], [0], [0], [0, 0, 1, 0], [], []>} : vector<8x8xbf16>, vector<8x8xbf16>, vector<8x8xf32> -> vector<8x8xf32>
    %cst_13 = arith.constant dense<0xFF800000> : vector<8xf32>
    %22 = vector.multi_reduction <maximumf>, %21, %cst_13 [1] : vector<8x8xf32> to vector<8xf32>
    %23 = vector.shape_cast %22 : vector<8xf32> to vector<8x1xf32>
    %24 = vector.broadcast %23 : vector<8x1xf32> to vector<8x8xf32>
    %25 = arith.subf %21, %24 : vector<8x8xf32>
    %26 = math.exp %25 : vector<8x8xf32>
    %cst_14 = arith.constant dense<0.000000e+00> : vector<8xf32>
    %27 = vector.multi_reduction <add>, %26, %cst_14 [1] : vector<8x8xf32> to vector<8xf32>
    %28 = vector.shape_cast %27 : vector<8xf32> to vector<8x1xf32>
    %29 = tpu.reciprocal %28 {approx = true} : vector<8x1xf32> -> vector<8x1xf32>
    %30 = vector.broadcast %29 : vector<8x1xf32> to vector<8x8xf32>
    %31 = arith.mulf %26, %30 : vector<8x8xf32>
    %c0_15 = arith.constant 0 : index
    %c0_16 = arith.constant 0 : index
    %c0_17 = arith.constant 0 : index
    %c0_18 = arith.constant 0 : index
    %32 = vector.load %arg7[%c0_15, %c0_16, %c0_17, %c0_18] : memref<1x4x8x8xf32, #tpu.memory_space<vmem>>, vector<1x1x8x8xf32>
    %33 = vector.shape_cast %32 : vector<1x1x8x8xf32> to vector<8x8xf32>
    %34 = vector.shape_cast %31 : vector<8x8xf32> to vector<1x1x8x8xf32>
    tpu.vector_store %arg7[%c0_15, %c0_16, %c0_17, %c0_18], %34 {strides = array<i32>} : memref<1x4x8x8xf32, #tpu.memory_space<vmem>>, vector<1x1x8x8xf32>,
    %35 = arith.truncf %31 : vector<8x8xf32> to vector<8x8xbf16>
    %36 = arith.truncf %18 : vector<8x8xf32> to vector<8x8xbf16>
    %cst_19 = arith.constant dense<0.000000e+00> : vector<8x8xf32>
    %37 = tpu.matmul %35, %36, %cst_19 {dimension_numbers = #tpu.dot_dimension_numbers<[1], [0], [0], [1], [0, 0, 1, 1], [], []>} : vector<8x8xbf16>, vector<8x8xbf16>, vector<8x8xf32> -> vector<8x8xf32>
    %38 = vector.extract_strided_slice %7 {offsets = [0, 8], sizes = [8, 8], strides = [1, 1]} : vector<8x96xf32> to vector<8x8xf32>
    %39 = vector.extract_strided_slice %7 {offsets = [0, 40], sizes = [8, 8], strides = [1, 1]} : vector<8x96xf32> to vector<8x8xf32>
    %40 = vector.extract_strided_slice %7 {offsets = [0, 72], sizes = [8, 8], strides = [1, 1]} : vector<8x96xf32> to vector<8x8xf32>
    %41 = arith.truncf %38 : vector<8x8xf32> to vector<8x8xbf16>
    %42 = arith.truncf %39 : vector<8x8xf32> to vector<8x8xbf16>
    %cst_20 = arith.constant dense<0.000000e+00> : vector<8x8xf32>
    %43 = tpu.matmul %41, %42, %cst_20 {dimension_numbers = #tpu.dot_dimension_numbers<[1], [1], [0], [0], [0, 0, 1, 0], [], []>} : vector<8x8xbf16>, vector<8x8xbf16>, vector<8x8xf32> -> vector<8x8xf32>
    %cst_21 = arith.constant dense<0xFF800000> : vector<8xf32>
    %44 = vector.multi_reduction <maximumf>, %43, %cst_21 [1] : vector<8x8xf32> to vector<8xf32>
    %45 = vector.shape_cast %44 : vector<8xf32> to vector<8x1xf32>
    %46 = vector.broadcast %45 : vector<8x1xf32> to vector<8x8xf32>
    %47 = arith.subf %43, %46 : vector<8x8xf32>
    %48 = math.exp %47 : vector<8x8xf32>
    %cst_22 = arith.constant dense<0.000000e+00> : vector<8xf32>
    %49 = vector.multi_reduction <add>, %48, %cst_22 [1] : vector<8x8xf32> to vector<8xf32>
    %50 = vector.shape_cast %49 : vector<8xf32> to vector<8x1xf32>
    %51 = tpu.reciprocal %50 {approx = true} : vector<8x1xf32> -> vector<8x1xf32>
    %52 = vector.broadcast %51 : vector<8x1xf32> to vector<8x8xf32>
    %53 = arith.mulf %48, %52 : vector<8x8xf32>
    %c0_23 = arith.constant 0 : index
    %c1 = arith.constant 1 : index
    %c0_24 = arith.constant 0 : index
    %c0_25 = arith.constant 0 : index
    %54 = vector.load %arg7[%c0_23, %c1, %c0_24, %c0_25] : memref<1x4x8x8xf32, #tpu.memory_space<vmem>>, vector<1x1x8x8xf32>
    %55 = vector.shape_cast %54 : vector<1x1x8x8xf32> to vector<8x8xf32>
    %56 = vector.shape_cast %53 : vector<8x8xf32> to vector<1x1x8x8xf32>
    tpu.vector_store %arg7[%c0_23, %c1, %c0_24, %c0_25], %56 {strides = array<i32>} : memref<1x4x8x8xf32, #tpu.memory_space<vmem>>, vector<1x1x8x8xf32>,
    %57 = arith.truncf %53 : vector<8x8xf32> to vector<8x8xbf16>
    %58 = arith.truncf %40 : vector<8x8xf32> to vector<8x8xbf16>
    %cst_26 = arith.constant dense<0.000000e+00> : vector<8x8xf32>
    %59 = tpu.matmul %57, %58, %cst_26 {dimension_numbers = #tpu.dot_dimension_numbers<[1], [0], [0], [1], [0, 0, 1, 1], [], []>} : vector<8x8xbf16>, vector<8x8xbf16>, vector<8x8xf32> -> vector<8x8xf32>
    %60 = vector.extract_strided_slice %7 {offsets = [0, 16], sizes = [8, 8], strides = [1, 1]} : vector<8x96xf32> to vector<8x8xf32>
    %61 = vector.extract_strided_slice %7 {offsets = [0, 48], sizes = [8, 8], strides = [1, 1]} : vector<8x96xf32> to vector<8x8xf32>
    %62 = vector.extract_strided_slice %7 {offsets = [0, 80], sizes = [8, 8], strides = [1, 1]} : vector<8x96xf32> to vector<8x8xf32>
    %63 = arith.truncf %60 : vector<8x8xf32> to vector<8x8xbf16>
    %64 = arith.truncf %61 : vector<8x8xf32> to vector<8x8xbf16>
    %cst_27 = arith.constant dense<0.000000e+00> : vector<8x8xf32>
    %65 = tpu.matmul %63, %64, %cst_27 {dimension_numbers = #tpu.dot_dimension_numbers<[1], [1], [0], [0], [0, 0, 1, 0], [], []>} : vector<8x8xbf16>, vector<8x8xbf16>, vector<8x8xf32> -> vector<8x8xf32>
    %cst_28 = arith.constant dense<0xFF800000> : vector<8xf32>
    %66 = vector.multi_reduction <maximumf>, %65, %cst_28 [1] : vector<8x8xf32> to vector<8xf32>
    %67 = vector.shape_cast %66 : vector<8xf32> to vector<8x1xf32>
    %68 = vector.broadcast %67 : vector<8x1xf32> to vector<8x8xf32>
    %69 = arith.subf %65, %68 : vector<8x8xf32>
    %70 = math.exp %69 : vector<8x8xf32>
    %cst_29 = arith.constant dense<0.000000e+00> : vector<8xf32>
    %71 = vector.multi_reduction <add>, %70, %cst_29 [1] : vector<8x8xf32> to vector<8xf32>
    %72 = vector.shape_cast %71 : vector<8xf32> to vector<8x1xf32>
    %73 = tpu.reciprocal %72 {approx = true} : vector<8x1xf32> -> vector<8x1xf32>
    %74 = vector.broadcast %73 : vector<8x1xf32> to vector<8x8xf32>
    %75 = arith.mulf %70, %74 : vector<8x8xf32>
    %c0_30 = arith.constant 0 : index
    %c2 = arith.constant 2 : index
    %c0_31 = arith.constant 0 : index
    %c0_32 = arith.constant 0 : index
    %76 = vector.load %arg7[%c0_30, %c2, %c0_31, %c0_32] : memref<1x4x8x8xf32, #tpu.memory_space<vmem>>, vector<1x1x8x8xf32>
    %77 = vector.shape_cast %76 : vector<1x1x8x8xf32> to vector<8x8xf32>
    %78 = vector.shape_cast %75 : vector<8x8xf32> to vector<1x1x8x8xf32>
    tpu.vector_store %arg7[%c0_30, %c2, %c0_31, %c0_32], %78 {strides = array<i32>} : memref<1x4x8x8xf32, #tpu.memory_space<vmem>>, vector<1x1x8x8xf32>,
    %79 = arith.truncf %75 : vector<8x8xf32> to vector<8x8xbf16>
    %80 = arith.truncf %62 : vector<8x8xf32> to vector<8x8xbf16>
    %cst_33 = arith.constant dense<0.000000e+00> : vector<8x8xf32>
    %81 = tpu.matmul %79, %80, %cst_33 {dimension_numbers = #tpu.dot_dimension_numbers<[1], [0], [0], [1], [0, 0, 1, 1], [], []>} : vector<8x8xbf16>, vector<8x8xbf16>, vector<8x8xf32> -> vector<8x8xf32>
    %82 = vector.extract_strided_slice %7 {offsets = [0, 24], sizes = [8, 8], strides = [1, 1]} : vector<8x96xf32> to vector<8x8xf32>
    %83 = vector.extract_strided_slice %7 {offsets = [0, 56], sizes = [8, 8], strides = [1, 1]} : vector<8x96xf32> to vector<8x8xf32>
    %84 = vector.extract_strided_slice %7 {offsets = [0, 88], sizes = [8, 8], strides = [1, 1]} : vector<8x96xf32> to vector<8x8xf32>
    %85 = arith.truncf %82 : vector<8x8xf32> to vector<8x8xbf16>
    %86 = arith.truncf %83 : vector<8x8xf32> to vector<8x8xbf16>
    %cst_34 = arith.constant dense<0.000000e+00> : vector<8x8xf32>
    %87 = tpu.matmul %85, %86, %cst_34 {dimension_numbers = #tpu.dot_dimension_numbers<[1], [1], [0], [0], [0, 0, 1, 0], [], []>} : vector<8x8xbf16>, vector<8x8xbf16>, vector<8x8xf32> -> vector<8x8xf32>
    %cst_35 = arith.constant dense<0xFF800000> : vector<8xf32>
    %88 = vector.multi_reduction <maximumf>, %87, %cst_35 [1] : vector<8x8xf32> to vector<8xf32>
    %89 = vector.shape_cast %88 : vector<8xf32> to vector<8x1xf32>
    %90 = vector.broadcast %89 : vector<8x1xf32> to vector<8x8xf32>
    %91 = arith.subf %87, %90 : vector<8x8xf32>
    %92 = math.exp %91 : vector<8x8xf32>
    %cst_36 = arith.constant dense<0.000000e+00> : vector<8xf32>
    %93 = vector.multi_reduction <add>, %92, %cst_36 [1] : vector<8x8xf32> to vector<8xf32>
    %94 = vector.shape_cast %93 : vector<8xf32> to vector<8x1xf32>
    %95 = tpu.reciprocal %94 {approx = true} : vector<8x1xf32> -> vector<8x1xf32>
    %96 = vector.broadcast %95 : vector<8x1xf32> to vector<8x8xf32>
    %97 = arith.mulf %92, %96 : vector<8x8xf32>
    %c0_37 = arith.constant 0 : index
    %c3 = arith.constant 3 : index
    %c0_38 = arith.constant 0 : index
    %c0_39 = arith.constant 0 : index
    %98 = vector.load %arg7[%c0_37, %c3, %c0_38, %c0_39] : memref<1x4x8x8xf32, #tpu.memory_space<vmem>>, vector<1x1x8x8xf32>
    %99 = vector.shape_cast %98 : vector<1x1x8x8xf32> to vector<8x8xf32>
    %100 = vector.shape_cast %97 : vector<8x8xf32> to vector<1x1x8x8xf32>
    tpu.vector_store %arg7[%c0_37, %c3, %c0_38, %c0_39], %100 {strides = array<i32>} : memref<1x4x8x8xf32, #tpu.memory_space<vmem>>, vector<1x1x8x8xf32>,
    %101 = arith.truncf %97 : vector<8x8xf32> to vector<8x8xbf16>
    %102 = arith.truncf %84 : vector<8x8xf32> to vector<8x8xbf16>
    %cst_40 = arith.constant dense<0.000000e+00> : vector<8x8xf32>
    %103 = tpu.matmul %101, %102, %cst_40 {dimension_numbers = #tpu.dot_dimension_numbers<[1], [0], [0], [1], [0, 0, 1, 1], [], []>} : vector<8x8xbf16>, vector<8x8xbf16>, vector<8x8xf32> -> vector<8x8xf32>
    %104 = tpu.concatenate %37, %59, %81, %103 in 1 : vector<8x8xf32>, vector<8x8xf32>, vector<8x8xf32>, vector<8x8xf32> -> vector<8x32xf32>
    %c0_41 = arith.constant 0 : index
    %c0_42 = arith.constant 0 : index
    %c0_43 = arith.constant 0 : index
    %105 = vector.load %arg4[%c0_41, %c0_42, %c0_43] : memref<1x8x32xf32, #tpu.memory_space<vmem>>, vector<1x8x32xf32>
    %106 = vector.shape_cast %105 : vector<1x8x32xf32> to vector<8x32xf32>
    %107 = vector.shape_cast %104 : vector<8x32xf32> to vector<1x8x32xf32>
    tpu.vector_store %arg4[%c0_41, %c0_42, %c0_43], %107 {strides = array<i32>} : memref<1x8x32xf32, #tpu.memory_space<vmem>>, vector<1x8x32xf32>,
    return
  }
  func.func @transform_0(%arg0: i32) -> (i32, i32, i32) {
    %c0_i32 = arith.constant 0 : i32
    %c0_i32_0 = arith.constant 0 : i32
    %c0_i32_1 = arith.constant 0 : i32
    return %arg0, %c0_i32, %c0_i32_0 : i32, i32, i32
  }
  func.func @transform_1(%arg0: i32) -> (i32, i32) {
    %c0_i32 = arith.constant 0 : i32
    %c0_i32_0 = arith.constant 0 : i32
    %c0_i32_1 = arith.constant 0 : i32
    return %c0_i32, %c0_i32_0 : i32, i32
  }
  func.func @transform_2(%arg0: i32) -> (i32, i32) {
    %c0_i32 = arith.constant 0 : i32
    %c0_i32_0 = arith.constant 0 : i32
    %c0_i32_1 = arith.constant 0 : i32
    return %c0_i32, %c0_i32_0 : i32, i32
  }
  func.func @transform_3(%arg0: i32) -> (i32, i32, i32) {
    %c0_i32 = arith.constant 0 : i32
    %c0_i32_0 = arith.constant 0 : i32
    %c0_i32_1 = arith.constant 0 : i32
    return %arg0, %c0_i32, %c0_i32_0 : i32, i32, i32
  }
  func.func @transform_4(%arg0: i32) -> (i32, i32, i32) {
    %c0_i32 = arith.constant 0 : i32
    %c0_i32_0 = arith.constant 0 : i32
    %c0_i32_1 = arith.constant 0 : i32
    return %arg0, %c0_i32, %c0_i32_0 : i32, i32, i32
  }
  func.func @transform_5(%arg0: i32) -> (i32, i32, i32) {
    %c0_i32 = arith.constant 0 : i32
    %c0_i32_0 = arith.constant 0 : i32
    %c0_i32_1 = arith.constant 0 : i32
    return %arg0, %c0_i32, %c0_i32_0 : i32, i32, i32
  }
  func.func @transform_6(%arg0: i32) -> (i32, i32, i32, i32) {
    %c0_i32 = arith.constant 0 : i32
    %c0_i32_0 = arith.constant 0 : i32
    %c0_i32_1 = arith.constant 0 : i32
    %c0_i32_2 = arith.constant 0 : i32
    return %arg0, %c0_i32, %c0_i32_0, %c0_i32_1 : i32, i32, i32, i32
  }
}

</mosaic_0001>

<bundles_post_ra>
// kernel: tpu_custom_call.1
= control target key start
LH: loop header
LB: loop body
LE: loop exit
PB: predicated region body
PF: predicated region fallthrough
CT: control target
= control target key end

     0   :  { %s2097_s0 = inlined_call_operand.hbm [shape: f32[2,8,32], index: 0, kind: input, shape index: {}]   ;;  %s2098_s1 = inlined_call_operand.hbm [shape: bf16[32,96], index: 1, kind: input, shape index: {}]   ;;  %s2099_s2 = inlined_call_operand.hbm [shape: f32[1,96], index: 2, kind: input, shape index: {}]   ;;  %s2100_s3 = inlined_call_operand.hbm [shape: f32[2,8,32], index: 3, kind: output, shape index: {0}]   ;;  %s2101_s4 = inlined_call_operand.hbm [shape: f32[2,8,32], index: 4, kind: output, shape index: {1}]   ;;  %s2102_s5 = inlined_call_operand.hbm [shape: f32[2,8,32], index: 5, kind: output, shape index: {2}]   ;;  %s2103_s6 = inlined_call_operand.hbm [shape: f32[2,4,8,8], index: 6, kind: output, shape index: {3}]  }
   0x1   :  { %2109 = sst [smem:[#allocation19_spill]] %s2097_s0 }
   0x2   :  { %2110 = sst [smem:[#allocation20_spill]] %s2098_s1 }
   0x3   :  { %12 = vsyncpa [#allocation3], 0 }
   0x4   :  { %14 = vsyncpa [#allocation3 + $0x1], 0 }
   0x5   :  { %15 = vsyncpa [#allocation6], 0 }
   0x6   :  { %16 = vsyncpa [#allocation4], 0 }
   0x7   :  { %18 = vsyncpa [#allocation4 + $0x1], 0 }
   0x8   :  { %19 = vsyncpa [#allocation10], 0 }
   0x9   :  { %21 = vsyncpa [#allocation10 + $0x1], 0 }
   0xa   :  { %22 = vsyncpa [#allocation13], 0 }
   0xb   :  { %24 = vsyncpa [#allocation13 + $0x1], 0  ;;  %s1668_s21 = smov 0   ;;  %s1670_s22 = smov 0  }
   0xc   :  { %s1672_s23 = smov 0   ;;  %s1674_s24 = smov 0  }
   0xd LB: > { %s1689_s25 = sadd.s32 4294967295, %s1605_s24   ;;  %s2107_s26 = sadd.s32 4294967294, %s1605_s24   ;;  %s1605_s24 = sphi %s1674_s24, %s2131_s24   ;;  %s1601_s23 = sphi %s1672_s23, %s2130_s23   ;;  %s1597_s22 = sphi %s1670_s22, %s2129_s22   ;;  %s1593_s21 = sphi %s1668_s21, %s2128_s21  }
   0xe   : > { %p50_p0 = scmp.ne.s32.totalorder %s1597_s22, %s1593_s21  ;;  %p2104_p1 = scmp.eq.s32.totalorder %s1689_s25, 0 }
   0xf   : > { %p122_p3 = scmp.eq.s32.totalorder %s2107_s26, 1  ;;  %p1122_p5 = scmp.ge.s32.totalorder %s1605_s24, 1 }
  0x10   : > { %p1700_p4 = por %p2104_p1, %p50_p0  ;;  %p207_p7 = scmp.lt.s32.totalorder %s1605_s24, 3 }
  0x11   : > { %p1705_p6 = por %p122_p3, %p50_p0  ;;  %s1607_s30 = smov [#allocation5]  }
  0x12   : > { %s2111_s27 = scalar_select %p1700_p4, 1, 0 }
  0x13   : > { %s2112_s28 = scalar_select %p1705_p6, 1, 0 }
  0x14   : > { %p1710_p8 = pnand %p1122_p5, %p207_p7  ;;  %s219_s7 = sshll.u32 %s1607_s30, 4  ;;  %s1714_s7 = int_to_ptr.vmem [resolvable:$true] %s219_s7 }
  0x15   : > { %s1608_s9 = smov [#allocation7]   ;;  %s2115_s1 = sld [smem:[#allocation20_spill]] }
  0x16   : > { %p1256_p9 = pneg %p1710_p8  ;;  %s233_s10 = sshll.u32 %s1608_s9, 4  ;;  %s1725_s10 = int_to_ptr.vmem [resolvable:$true] %s233_s10 }
  0x18   : > { %p1721_p11 = pnand %p1256_p9, %p2104_p1 }
  0x1a   : > { %p1359_p13 = pneg %p1721_p11 }
  0x1b   : > { %s1357_s13 = scalar_lea.hbm %s2115_s1, 256 }
  0x1c   : > { %p1358_p12 = scmp.ne.s32.totalorder %s2115_s1, %s1357_s13  ;;  %p1364_p5 = scmp.lt.u32.totalorder %s1357_s13, %s2115_s1 }
  0x1e   : > { %p1360_p0 = pnand %p1359_p13, %p1358_p12 }
  0x20   : > { %p1361_p3 = pneg %p1360_p0 }
  0x22   : > { %p1366_p7 = pnand %p1364_p5, %p1361_p3 }
  0x24   : > { %1369 = shalt.err (!%p1366_p7)
}
  0x25   : > { %s1370_s18 = scalar_lea.vmem %s1714_s7, 256  ;;  %p1378_p2 = scmp.lt.s32.totalorder %s1714_s7, %s1714_s7 }
  0x26   : > { %p1371_p9 = scmp.ne.s32.totalorder %s1714_s7, %s1370_s18  ;;  %p1379_p12 = scmp.lt.s32.totalorder %s1370_s18, %s1370_s18 }
  0x28   : > { %p1373_p10 = pnand %p1371_p9, %p1359_p13  ;;  %p1380_p0 = por %p1379_p12, %p1378_p2 }
  0x2a   : > { %p1374_p1 = pneg %p1373_p10 }
  0x2c   : > { %p1381_p6 = pnand %p1380_p0, %p1374_p1 }
  0x2e   : > { %1384 = shalt.err (!%p1381_p6)
}
  0x2f   : > { %s1609_s19 = smov 64   ;;  %s1610_s20 = smov 4  }
  0x30   : > { %1259 = dma.hbm_to_vmem [thread:$0]  (!%p1721_p11), %s2115_s1, 256, %s1714_s7, [#allocation6], %s1609_s19, %s1609_s19, %s1610_s20  }
  0x31   : > { %s1385_s13 = scalar_lea.hbm %s2099_s2, 16 }
  0x32   : > { %p1386_p2 = scmp.ne.s32.totalorder %s2099_s2, %s1385_s13  ;;  %p1392_p10 = scmp.lt.u32.totalorder %s1385_s13, %s2099_s2 }
  0x34   : > { %p1388_p1 = pnand %p1386_p2, %p1359_p13 }
  0x36   : > { %p1389_p6 = pneg %p1388_p1 }
  0x38   : > { %p1394_p3 = pnand %p1392_p10, %p1389_p6 }
  0x3a   : > { %1397 = shalt.err (!%p1394_p3)
}
  0x3b   : > { %s1398_s7 = scalar_lea.vmem %s1725_s10, 16  ;;  %s1405_s18 = scalar_lea.vmem %s1725_s10, 32 }
  0x3c   : > { %p1399_p5 = scmp.ne.s32.totalorder %s1725_s10, %s1398_s7  ;;  %p1406_p12 = scmp.lt.s32.totalorder %s1725_s10, %s1725_s10 }
  0x3d   : > { %p1407_p0 = scmp.lt.s32.totalorder %s1405_s18, %s1398_s7 }
  0x3e   : > { %p1401_p7 = pnand %p1399_p5, %p1359_p13 }
  0x3f   : > { %p1408_p2 = por %p1407_p0, %p1406_p12 }
  0x40   : > { %p1402_p9 = pneg %p1401_p7 }
  0x42   : > { %p1409_p1 = pnand %p1408_p2, %p1402_p9 }
  0x44   : > { %1412 = shalt.err (!%p1409_p1)
}
  0x45   : > { %1262 = dma.hbm_to_vmem [thread:$0]  (!%p1721_p11), %s2099_s2, 16, %s1725_s10, [#allocation6]  }
  0x46   : > { %s1781_s30 = sadd.s32 1, %s1605_s24   ;;  %s37_s8 = sadd.s32 1, %s1601_s23 }
  0x47   : > { %s34_s9 = ssub.s32 %s1605_s24, %s1781_s30  ;;  %p44_p13 = scmp.ne.s32.totalorder %s1601_s23, %s1597_s22 }
  0x48   : > { %p35_p6 = scmp.eq.s32.totalorder %s34_s9, 0  ;;  %p45_p10 = scmp.eq.s32.totalorder %s1605_s24, 0 }
  0x49   : > { %p2116_p3 = scmp.eq.s32.totalorder %s1689_s25, 1  ;;  %p1282_p7 = scmp.lt.s32.totalorder %s1605_s24, 2 }
  0x4a   : > { %s1797_s12 = scalar_select %p35_p6, %s1601_s23, %s37_s8  }
  0x4b   : > { %p1791_p5 = por %p2116_p3, %p44_p13  ;;  %p46_p9 = por %p45_p10, %p44_p13 }
  0x4c   : > { %s244_s13 = sand.u32 1, %s1601_s23   ;;  %s1127_s10 = sshll.u32 %s1605_s24, 7 }
  0x4d   : > { %s2117_s11 = scalar_select %p1791_p5, 1, 0 }
  0x4e   : > { %s1126_s14 = sshll.u32 %s244_s13, 3  ;;  %s2118_s0 = sld [smem:[#allocation19_spill]] }
  0x4f   : > { %s248_s7 = scalar_lea.vmem [#allocation2], %s1126_s14  ;;  %p1808_p11 = pnand %p1282_p7, %p46_p9 }
  0x50   : > { %s255_s18 = sshll.u32 %s248_s7, 4  ;;  %s245_s20 = scalar_lea.sflag [#allocation3], %s244_s13  ;;  %s1806_s18 = int_to_ptr.vmem [resolvable:$true] %s255_s18 }
  0x51   : > { %p1415_p0 = pneg %p1808_p11 }
  0x54   : > { %s1804_s17 = scalar_lea.hbm %s2118_s0, %s1127_s10  ;;  %s1418_s10 = scalar_lea.hbm %s2118_s0, 256 }
  0x55   : > { %s1413_s8 = scalar_lea.hbm %s1804_s17, 128  ;;  %p1419_p13 = scmp.lt.u32.totalorder %s1804_s17, %s2118_s0 }
  0x56   : > { %p1414_p12 = scmp.ne.s32.totalorder %s1804_s17, %s1413_s8  ;;  %p1420_p6 = scmp.lt.u32.totalorder %s1418_s10, %s1413_s8 }
  0x57   : > { %p1422_p3 = scmp.lt.u32.totalorder %s1413_s8, %s1804_s17 }
  0x58   : > { %p1416_p2 = pnand %p1415_p0, %p1414_p12  ;;  %p1421_p10 = por %p1420_p6, %p1419_p13 }
  0x5a   : > { %p1417_p1 = pneg %p1416_p2  ;;  %p1423_p7 = por %p1422_p3, %p1421_p10 }
  0x5c   : > { %p1424_p9 = pnand %p1423_p7, %p1417_p1 }
  0x5e   : > { %1427 = shalt.err (!%p1424_p9)
}
  0x5f   : > { %s1428_s13 = scalar_lea.vmem %s1806_s18, 128  ;;  %s1611_s7 = smov [#allocation2]  }
  0x60   : > { %p1429_p12 = scmp.ne.s32.totalorder %s1806_s18, %s1428_s13  ;;  %s1433_s9 = sshll.u32 %s1611_s7, 4  ;;  %s1434_s9 = int_to_ptr.vmem [resolvable:$false] %s1433_s9 }
  0x61   : > { %s1435_s14 = scalar_lea.vmem %s1434_s9, 256  ;;  %p1436_p4 = scmp.lt.s32.totalorder %s1806_s18, %s1434_s9 }
  0x62   : > { %p1431_p2 = pnand %p1429_p12, %p1415_p0  ;;  %p1437_p13 = scmp.lt.s32.totalorder %s1435_s14, %s1428_s13 }
  0x64   : > { %p1432_p5 = pneg %p1431_p2  ;;  %p1438_p6 = por %p1437_p13, %p1436_p4 }
  0x66   : > { %p1439_p10 = pnand %p1438_p6, %p1432_p5 }
  0x68   : > { %1442 = shalt.err (!%p1439_p10)
}
  0x69   : > { %1266 = dma.hbm_to_vmem [thread:$0]  (!%p1808_p11), %s1804_s17, 128, %s1806_s18, %s245_s20  }
  0x6a   : > { %264 = sbr.rel (%p1710_p8) target bundleno = 1432 (0x598), region = 32  ;;  %s1840_s8 = sand.u32 (!%p1710_p8), 1, %s1597_s22  }
  0x6b   : > { %s1843_s10 = sshll.u32 (!%p1710_p8), %s1840_s8, 3  ;;  %s267_s15 = scalar_lea.sflag (!%p1710_p8), [#allocation3], %s1840_s8 }
  0x6c   : > { %s270_s16 = scalar_lea.vmem (!%p1710_p8), [#allocation2], %s1843_s10  ;;  %p2120_p4 = scmp.ne.s32.totalorder (!%p1710_p8), %s2111_s27, 0 }
  0x71   : > { %1572 = dma.done.wait (%p2120_p4), %s267_s15, 128  }
  0x72   : > { %1574 = vsyncadd (%p2120_p4), %s267_s15, 4294967168  ;;  %p2121_p5 = scmp.eq.s32.totalorder %s1689_s25, 0 }
  0x74   : > { %1576 = dma.done.wait (%p2121_p5), [#allocation6], 272   ;;  %p2122_p8 = pmov %p2121_p5 }
  0x75   : > { %v1612_v0 = vmov 0.0   ;;  %vm1613_vm0 = vmmov 0   ;;  %v1339_v1 = vld [vmem:[#allocation5] sm:$0xff]   ;;  %v1340_v2 = vld [vmem:[#allocation5 + $0x8] sm:$0xff]   ;;  %v323_v3 = vld [vmem:[%s270_s16] sm:$0xff]  ;;  %vm348_vm1 = vcmask 261120  }
  0x76   : > { %1578 = vsyncadd (%p2122_p8), [#allocation6], 4294967024  ;;  %1182 = vmatprep.subr.bf16.mxu0 %v1612_v0  ;;  %1186 = vmatprep.mubr.msk.bf16.mxu0 %vm1613_vm0, %v1612_v0  ;;  %v324_v4 = vpack.c.bf16 %v323_v3, %v323_v3  ;;  %v1136_v5 = vld [vmem:[#allocation7] ss:$0 sm:$0xff]  ;;  %s1614_s27 = smov 120   ;;  %s1615_s29 = smov 96  }
  0x77   : > { %1190 = vmatprep.subr.bf16.mxu1 %v1612_v0  ;;  %1192 = vmatprep.mubr.msk.bf16.mxu1 %vm1613_vm0, %v1612_v0  ;;  %s1616_s17 = smov 80   ;;  %s1617_s18 = smov 88   ;;  %vm405_vm2 = vcmask 64512   ;;  %vm470_vm3 = vcmask 1043456  }
  0x78   : > { %1183 = vmatpush3.bf16.msra.mxu0 %v1339_v1  ;;  %s1618_s19 = smov 72   ;;  %s1619_s20 = smov 112  }
  0x79   : > { %1184 = vmatprep.subr.bf16.mxu0 %v1612_v0  ;;  %s1620_s13 = smov 104   ;;  %s1621_s7 = smov 56  }
  0x7a   : > { %s1622_s9 = smov 64   ;;  %s1623_s14 = smov 40  }
  0x7b   : > { %s1624_s15 = smov 48   ;;  %s1135_s16 = sshll.u32 %s1840_s8, 5 }
  0x7c   : > { %1185 = vmatpush3.bf16.msra.mxu0 %v1340_v2  ;;  %p2123_p0 = scmp.ne.s32.totalorder %s2117_s11, 0 }
  0x7d   : > { %1196 = vmatprep.subr.bf16.mxu0 %v1612_v0 }
  0x7f   : > { %1187 = vmatmul.mubr.msk.bf16.vlgmr.msra.gmra.mrb[0].mxu0 %vm348_vm1, %v324_v4 }
  0x80   : > { %1198 = vmatprep.mubr.msk.bf16.mxu0 %vm1613_vm0, %v1612_v0 }
 0x152   : > { %v386_v6 = vpop.f32.mrb[0].mxu0 }
 0x153   : > { %v1866_v7 = vadd.f32 %v1136_v5, %v386_v6  ;;  %v1188_v8 = vpop.f32.mrb[1].mxu0 }
 0x154   : > { %v389_v9 = vpop.f32.mrb[2].mxu0 }
 0x155   : > { %v1870_v10 = vpack.c.bf16 %v1866_v7, %v1866_v7  ;;  %v1189_v11 = vpop.f32.mrb[3].mxu0 }
 0x157   : > { %514 = vrot.lane.b32.xlu1 %v1870_v10, %s1614_s27  ;;  %403 = vrot.lane.b32.xlu0 %v1870_v10, %s1615_s29  ;;  %s1914_s27 = scalar_lea.vmem [#allocation12], %s1135_s16 }
 0x15b   : > { %628 = vrot.lane.b32.xlu1 %v1870_v10, %s1616_s17  ;;  %516 = vrot.lane.b32.xlu0 %v1870_v10, %s1617_s18  ;;  %s307_s17 = scalar_lea.vmem [#allocation9], %s1843_s10  ;;  %s2108_s18 = smov 8  }
 0x15f   : > { %740 = vrot.lane.b32.xlu1 %v1870_v10, %s1618_s19  ;;  %626 = vrot.lane.b32.xlu0 %v1870_v10, %s1619_s20  ;;  %s873_s19 = sand.u32 1, %s1689_s25   ;;  %s1952_s20 = sshll.u32 %s1689_s25, 7 }
 0x160   : > { %s1964_s16 = scalar_lea.sflag [#allocation10], %s873_s19 }
 0x163   : > { %738 = vrot.lane.b32.xlu0 %v1870_v10, %s1620_s13 }
 0x1c9   : > { %v404_v12 = vpop.permute.xlu0 %403  ;;  %v515_v15 = vpop.permute.xlu1 %514 }
 0x1ca   : > { %v410_v13 = vsel %vm405_vm2, %v404_v12, 0 }
 0x1cb   : > { %1191 = vmatpush3.bf16.xpose.msra.mxu1 %v410_v13 }
 0x1cc   : > { %1202 = vmatprep.subr.bf16.mxu1 %v1612_v0 }
 0x1cd   : > { %v517_v14 = vpop.permute.xlu0 %516  ;;  %v629_v17 = vpop.permute.xlu1 %628 }
 0x1ce   : > { %v522_v16 = vsel %vm405_vm2, %v517_v14, 0  ;;  %v634_v18 = vsel %vm405_vm2, %v629_v17, 0 }
 0x1d1   : > { %v741_v19 = vpop.permute.xlu1 %740  ;;  %v627_v20 = vpop.permute.xlu0 %626 }
 0x1d2   : > { %1193 = vmatmul.mubr.msk.bf16.vlgmr.msra.gmra.mrb[0].mxu1 %vm405_vm2, %v1870_v10  ;;  %v746_v21 = vsel %vm405_vm2, %v741_v19, 0 }
 0x1d3   : > { %1203 = vmatpush3.bf16.xpose.msra.mxu1 %v522_v16  ;;  %1204 = vmatprep.mubr.msk.bf16.mxu1 %vm1613_vm0, %v1612_v0 }
 0x1d4   : > { %1214 = vmatprep.subr.bf16.mxu1 %v1612_v0 }
 0x1d5   : > { %v739_v22 = vpop.permute.xlu0 %738 }
 0x1da   : > { %1205 = vmatmul.mubr.msk.bf16.vlgmr.msra.gmra.mrb[4].mxu1 %vm405_vm2, %v515_v15 }
 0x1db   : > { %1215 = vmatpush3.bf16.xpose.msra.mxu1 %v634_v18  ;;  %1216 = vmatprep.mubr.msk.bf16.mxu1 %vm1613_vm0, %v1612_v0 }
 0x1dc   : > { %1226 = vmatprep.subr.bf16.mxu1 %v1612_v0 }
 0x1e2   : > { %1217 = vmatmul.mubr.msk.bf16.vlgmr.msra.gmra.mrb[8].mxu1 %vm405_vm2, %v627_v20 }
 0x1e3   : > { %1227 = vmatpush3.bf16.xpose.msra.mxu1 %v746_v21  ;;  %1228 = vmatprep.mubr.msk.bf16.mxu1 %vm1613_vm0, %v1612_v0 }
 0x1ea   : > { %1229 = vmatmul.mubr.msk.bf16.vlgmr.msra.gmra.mrb[12].mxu1 %vm405_vm2, %v739_v22 }
 0x2a5   : > { %v446_v23 = vpop.f32.mrb[0].mxu1 }
 0x2a6   : > { %v1194_v24 = vpop.f32.mrb[1].mxu1  ;;  %v452_v25 = vsel %vm405_vm2, %v446_v23, -inf }
 0x2a7   : > { %453 = vmax.xlane.f32.xlu1 %v452_v25  ;;  %v449_v26 = vpop.f32.mrb[2].mxu1 }
 0x2a8   : > { %v1195_v27 = vpop.f32.mrb[3].mxu1 }
 0x2ad   : > { %v558_v28 = vpop.f32.mrb[4].mxu1 }
 0x2ae   : > { %v1206_v29 = vpop.f32.mrb[5].mxu1  ;;  %v564_v30 = vsel %vm405_vm2, %v558_v28, -inf }
 0x2af   : > { %565 = vmax.xlane.f32.xlu0 %v564_v30  ;;  %v561_v31 = vpop.f32.mrb[6].mxu1 }
 0x2b0   : > { %v1207_v32 = vpop.f32.mrb[7].mxu1 }
 0x2b5   : > { %v670_v33 = vpop.f32.mrb[8].mxu1 }
 0x2b6   : > { %v1218_v34 = vpop.f32.mrb[9].mxu1  ;;  %v676_v35 = vsel %vm405_vm2, %v670_v33, -inf }
 0x2b7   : > { %677 = vmax.xlane.f32.xlu0 %v676_v35  ;;  %v673_v36 = vpop.f32.mrb[10].mxu1 }
 0x2b8   : > { %v1219_v37 = vpop.f32.mrb[11].mxu1 }
 0x2bd   : > { %v782_v38 = vpop.f32.mrb[12].mxu1 }
 0x2be   : > { %v1230_v39 = vpop.f32.mrb[13].mxu1  ;;  %v788_v40 = vsel %vm405_vm2, %v782_v38, -inf }
 0x2bf   : > { %789 = vmax.xlane.f32.xlu1 %v788_v40  ;;  %v785_v41 = vpop.f32.mrb[14].mxu1 }
 0x2c0   : > { %v1231_v42 = vpop.f32.mrb[15].mxu1 }
 0x334   : > { %v454_v43 = vpop.xlane.xlu1 %453 }
 0x335   : > { %v455_v44 = vsub.f32 %v446_v23, %v454_v43 }
 0x337   : > { %v456_v45 = vmul.f32 1.442695, %v455_v44 }
 0x339   : > { %1341 = vpow2.f32 %v456_v45 }
 0x33c   : > { %v566_v46 = vpop.xlane.xlu0 %565 }
 0x33d   : > { %v567_v47 = vsub.f32 %v558_v28, %v566_v46 }
 0x33f   : > { %v568_v48 = vmul.f32 1.442695, %v567_v47 }
 0x341   : > { %1343 = vpow2.f32 %v568_v48 }
 0x343   : > { %v1342_v49 = vpop.eup %1341 }
 0x344   : > { %v678_v50 = vpop.xlane.xlu0 %677  ;;  %v458_v51 = vsel %vm405_vm2, %v1342_v49, 0.0 }
 0x345   : > { %v679_v52 = vsub.f32 %v670_v33, %v678_v50  ;;  %459 = vadd.xlane.f32.xlu0 %v458_v51 }
 0x347   : > { %v680_v53 = vmul.f32 1.442695, %v679_v52 }
 0x349   : > { %1345 = vpow2.f32 %v680_v53 }
 0x34b   : > { %v1344_v54 = vpop.eup %1343 }
 0x34c   : > { %v570_v55 = vsel %vm405_vm2, %v1344_v54, 0.0  ;;  %v790_v58 = vpop.xlane.xlu1 %789 }
 0x34d   : > { %571 = vadd.xlane.f32.xlu1 %v570_v55  ;;  %v791_v59 = vsub.f32 %v782_v38, %v790_v58 }
 0x34f   : > { %v792_v60 = vmul.f32 1.442695, %v791_v59 }
 0x351   : > { %1347 = vpow2.f32 %v792_v60 }
 0x353   : > { %v1346_v56 = vpop.eup %1345 }
 0x354   : > { %v682_v57 = vsel %vm405_vm2, %v1346_v56, 0.0 }
 0x355   : > { %683 = vadd.xlane.f32.xlu0 %v682_v57 }
 0x35b   : > { %v1348_v61 = vpop.eup %1347 }
 0x35c   : > { %v794_v62 = vsel %vm405_vm2, %v1348_v61, 0.0 }
 0x35e   : > { %578 = vrot.lane.b32.xlu1 %v1870_v10, %s1621_s7 }
 0x36b   : > { %465 = vrot.lane.b32.xlu0 %v1870_v10, %s1622_s9 }
 0x36f   : > { %802 = vrot.lane.b32.xlu0 %v1870_v10, %s1623_s14 }
 0x373   : > { %397 = vrot.lane.b32.xlu0 %v1866_v7, %s1622_s9  ;;  %s1958_s9 = scalar_lea.hbm %s2101_s4, %s1952_s20 }
 0x382   : > { %795 = vadd.xlane.f32.xlu1 %v794_v62 }
 0x393   : > { %690 = vrot.lane.b32.xlu1 %v1870_v10, %s1624_s15  ;;  %s910_s15 = sshll.u32 %s307_s17, 4  ;;  %s911_s15 = int_to_ptr.vmem [resolvable:$true] %s910_s15 }
 0x394   : > { %s1443_s26 = scalar_lea.vmem %s911_s15, 128 }
 0x395   : > { %p1444_p11 = scmp.ne.s32.totalorder %s911_s15, %s1443_s26 }
 0x397   : > { %393 = vrot.lane.b32.xlu1 %v1866_v7, %s1615_s29  ;;  %s314_s29 = scalar_lea.vmem [#allocation11], %s1843_s10  ;;  %p1445_p1 = pnand %p1444_p11, %p2123_p0 }
 0x398   : > { %s1962_s14 = sshll.u32 %s314_s29, 4  ;;  %s924_s14 = int_to_ptr.vmem [resolvable:$true] %s1962_s14 }
 0x399   : > { %p1446_p3 = pneg %p1445_p1 }
 0x3d2   : > { %v460_v63 = vpop.xlane.xlu0 %459 }
 0x3d3   : > { %1349 = vrcp.f32 %v460_v63 }
 0x3da   : > { %v572_v1 = vpop.xlane.xlu1 %571 }
 0x3db   : > { %1351 = vrcp.f32 %v572_v1 }
 0x3dd   : > { %v1350_v2 = vpop.eup %1349 }
 0x3de   : > { %v462_v3 = vmul.f32 %v1350_v2, %v1342_v49  ;;  %v579_v9 = vpop.permute.xlu1 %578 }
 0x3df   : > { %v584_v12 = vsel %vm470_vm3, %v579_v9, 0 }
 0x3e0   : > { %463 = vst.msk [vmem:[%s1914_s27] sm:$0xff] %vm405_vm2, %v462_v3  ;;  %v464_v10 = vpack.c.bf16 %v462_v3, %v462_v3 }
 0x3e2   : > { %v684_v4 = vpop.xlane.xlu0 %683 }
 0x3e3   : > { %1353 = vrcp.f32 %v684_v4 }
 0x3e5   : > { %v1352_v5 = vpop.eup %1351 }
 0x3e6   : > { %v574_v6 = vmul.f32 %v1352_v5, %v1344_v54  ;;  %v466_v8 = vpop.permute.xlu0 %465 }
 0x3e7   : > { %v472_v7 = vsel %vm470_vm3, %v466_v8, 0 }
 0x3e8   : > { %1143 = vst.msk [vmem:[%s1914_s27 + $0x8] sm:$0xff] %vm405_vm2, %v574_v6  ;;  %1197 = vmatpush3.bf16.msra.mxu0 %v472_v7  ;;  %v577_v16 = vpack.c.bf16 %v574_v6, %v574_v6 }
 0x3e9   : > { %1208 = vmatprep.subr.bf16.mxu0 %v1612_v0 }
 0x3ea   : > { %v803_v11 = vpop.permute.xlu0 %802 }
 0x3eb   : > { %1199 = vmatmul.mubr.msk.bf16.vlgmr.msra.gmra.mrb[4].mxu0 %vm405_vm2, %v464_v10  ;;  %v808_v22 = vsel %vm470_vm3, %v803_v11, 0 }
 0x3ec   : > { %1209 = vmatpush3.bf16.msra.mxu0 %v584_v12  ;;  %1210 = vmatprep.mubr.msk.bf16.mxu0 %vm1613_vm0, %v1612_v0 }
 0x3ed   : > { %v1354_v13 = vpop.eup %1353  ;;  %1220 = vmatprep.subr.bf16.mxu0 %v1612_v0 }
 0x3ee   : > { %v686_v14 = vmul.f32 %v1354_v13, %v1346_v56  ;;  %v398_v15 = vpop.permute.xlu0 %397 }
 0x3ef   : > { %400 = vst.msk [vmem:[%s314_s29] sm:$0xff] %vm348_vm1, %v398_v15 }
 0x3f0   : > { %1146 = vst.msk [vmem:[%s1914_s27 + $0x10] sm:$0xff] %vm405_vm2, %v686_v14  ;;  %v689_v20 = vpack.c.bf16 %v686_v14, %v686_v14 }
 0x3f3   : > { %1211 = vmatmul.mubr.msk.bf16.vlgmr.msra.gmra.mrb[8].mxu0 %vm405_vm2, %v577_v16 }
 0x3f4   : > { %1222 = vmatprep.mubr.msk.bf16.mxu0 %vm1613_vm0, %v1612_v0 }
 0x40f   : > { %v796_v17 = vpop.xlane.xlu1 %795 }
 0x410   : > { %1355 = vrcp.f32 %v796_v17 }
 0x413   : > { %v691_v18 = vpop.permute.xlu1 %690 }
 0x414   : > { %v696_v19 = vsel %vm470_vm3, %v691_v18, 0 }
 0x415   : > { %1221 = vmatpush3.bf16.msra.mxu0 %v696_v19 }
 0x416   : > { %1232 = vmatprep.subr.bf16.mxu0 %v1612_v0 }
 0x417   : > { %v394_v21 = vpop.permute.xlu1 %393 }
 0x418   : > { %396 = vst.msk [vmem:[%s307_s17] sm:$0xff] %vm348_vm1, %v394_v21  ;;  %1223 = vmatmul.mubr.msk.bf16.vlgmr.msra.gmra.mrb[12].mxu0 %vm405_vm2, %v689_v20 }
 0x419   : > { %1233 = vmatpush3.bf16.msra.mxu0 %v808_v22  ;;  %1234 = vmatprep.mubr.msk.bf16.mxu0 %vm1613_vm0, %v1612_v0 }
 0x41a   : > { %v1356_v23 = vpop.eup %1355 }
 0x41b   : > { %v798_v24 = vmul.f32 %v1356_v23, %v1348_v61 }
 0x41d   : > { %1149 = vst.msk [vmem:[%s1914_s27 + $0x18] sm:$0xff] %vm405_vm2, %v798_v24  ;;  %v801_v25 = vpack.c.bf16 %v798_v24, %v798_v24 }
 0x420   : > { %1235 = vmatmul.mubr.msk.bf16.vlgmr.msra.gmra.mrb[16].mxu0 %vm405_vm2, %v801_v25 }
 0x4be   : > { %v1947_v26 = vpop.f32.mrb[4].mxu0 }
 0x4bf   : > { %v1200_v27 = vpop.f32.mrb[5].mxu0 }
 0x4c0   : > { %v511_v28 = vpop.f32.mrb[6].mxu0 }
 0x4c1   : > { %v1201_v29 = vpop.f32.mrb[7].mxu0 }
 0x4c6   : > { %v620_v30 = vpop.f32.mrb[8].mxu0 }
 0x4c7   : > { %851 = vrot.lane.b32.xlu1 %v620_v30, %s2108_s18  ;;  %v1212_v0 = vpop.f32.mrb[9].mxu0  ;;  %s1626_s18 = smov [#allocation9]  }
 0x4c8   : > { %v623_v31 = vpop.f32.mrb[10].mxu0  ;;  %s1447_s0 = sshll.u32 %s1626_s18, 4  ;;  %s1448_s0 = int_to_ptr.vmem [resolvable:$false] %s1447_s0 }
 0x4c9   : > { %v1213_v32 = vpop.f32.mrb[11].mxu0  ;;  %s1449_s1 = scalar_lea.vmem %s1448_s0, 256  ;;  %p1450_p7 = scmp.lt.s32.totalorder %s911_s15, %s1448_s0 }
 0x4ca   : > { %p1451_p9 = scmp.lt.s32.totalorder %s1449_s1, %s1443_s26 }
 0x4cc   : > { %p1452_p12 = por %p1451_p9, %p1450_p7 }
 0x4ce   : > { %p1453_p2 = pnand %p1452_p12, %p1446_p3 }
 0x4d0   : > { %1456 = shalt.err (!%p1453_p2)
}
 0x4d1   : > { %s1457_s29 = scalar_lea.hbm %s1958_s9, 128  ;;  %s1461_s18 = scalar_lea.hbm %s2101_s4, 256 }
 0x4d2   : > { %p1458_p13 = scmp.ne.s32.totalorder %s1958_s9, %s1457_s29  ;;  %p1462_p4 = scmp.lt.u32.totalorder %s1958_s9, %s2101_s4 }
 0x4d3   : > { %p1463_p5 = scmp.lt.u32.totalorder %s1461_s18, %s1457_s29  ;;  %p1465_p11 = scmp.lt.u32.totalorder %s1457_s29, %s1958_s9 }
 0x4d4   : > { %p1459_p6 = pnand %p1458_p13, %p2123_p0 }
 0x4d5   : > { %p1464_p8 = por %p1463_p5, %p1462_p4 }
 0x4d6   : > { %p1460_p10 = pneg %p1459_p6 }
 0x4d7   : > { %p1466_p1 = por %p1465_p11, %p1464_p8 }
 0x4d9   : > { %p1467_p3 = pnand %p1466_p1, %p1460_p10 }
 0x4db   : > { %1470 = shalt.err (!%p1467_p3)
}
 0x4dc   : > { %1249 = dma.vmem_to_hbm [thread:$0]  (%p2123_p0), %s911_s15, 128, %s1958_s9, %s1964_s16  }
 0x4dd   : > { %s1627_s1 = smov 16   ;;  %s1988_s17 = scalar_lea.hbm %s2102_s5, %s1952_s20 }
 0x4de   : > { %s1471_s29 = scalar_lea.vmem %s924_s14, 128  ;;  %s1628_s19 = smov [#allocation11]  }
 0x4df   : > { %p1472_p7 = scmp.ne.s32.totalorder %s924_s14, %s1471_s29  ;;  %s1475_s18 = sshll.u32 %s1628_s19, 4  ;;  %s1476_s18 = int_to_ptr.vmem [resolvable:$false] %s1475_s18 }
 0x4e0   : > { %s1477_s9 = scalar_lea.vmem %s1476_s18, 256  ;;  %p1478_p2 = scmp.lt.s32.totalorder %s924_s14, %s1476_s18 }
 0x4e1   : > { %p1473_p9 = pnand %p1472_p7, %p2123_p0  ;;  %p1479_p13 = scmp.lt.s32.totalorder %s1477_s9, %s1471_s29 }
 0x4e3   : > { %p1474_p12 = pneg %p1473_p9  ;;  %p1480_p6 = por %p1479_p13, %p1478_p2 }
 0x4e5   : > { %p1481_p10 = pnand %p1480_p6, %p1474_p12 }
 0x4eb   : > { %v732_v33 = vpop.f32.mrb[12].mxu0 }
 0x4ec   : > { %855 = vrot.lane.b32.xlu0 %v732_v33, %s1627_s1  ;;  %v1224_v34 = vpop.f32.mrb[13].mxu0 }
 0x4ed   : > { %v735_v35 = vpop.f32.mrb[14].mxu0 }
 0x4ee   : > { %v1225_v36 = vpop.f32.mrb[15].mxu0 }
 0x4ef   : > { %1484 = shalt.err (!%p1481_p10)
}
 0x4f0   : > { %s1485_s15 = scalar_lea.hbm %s1988_s17, 128  ;;  %s1489_s1 = scalar_lea.hbm %s2102_s5, 256 }
 0x4f1   : > { %p1486_p4 = scmp.ne.s32.totalorder %s1988_s17, %s1485_s15  ;;  %p1490_p11 = scmp.lt.u32.totalorder %s1988_s17, %s2102_s5 }
 0x4f2   : > { %p1491_p1 = scmp.lt.u32.totalorder %s1489_s1, %s1485_s15  ;;  %p1493_p7 = scmp.lt.u32.totalorder %s1485_s15, %s1988_s17 }
 0x4f3   : > { %p1487_p5 = pnand %p1486_p4, %p2123_p0 }
 0x4f4   : > { %p1492_p3 = por %p1491_p1, %p1490_p11 }
 0x4f5   : > { %p1488_p8 = pneg %p1487_p5 }
 0x4f6   : > { %p1494_p9 = por %p1493_p7, %p1492_p3 }
 0x4f8   : > { %p1495_p12 = pnand %p1494_p9, %p1488_p8 }
 0x4fa   : > { %1498 = shalt.err (!%p1495_p12)
}
 0x4fb   : > { %1250 = dma.vmem_to_hbm [thread:$0]  (%p2123_p0), %s924_s14, 128, %s1988_s17, %s1964_s16  }
 0x4fc   : > { %s1162_s29 = sshll.u32 %s1689_s25, 9  ;;  %s936_s19 = sshll.u32 %s1914_s27, 4  ;;  %s2016_s19 = int_to_ptr.vmem [resolvable:$true] %s936_s19 }
 0x4fd   : > { %s2014_s13 = scalar_lea.hbm %s2103_s6, %s1162_s29  ;;  %s884_s15 = scalar_lea.sflag [#allocation13], %s1840_s8 }
 0x4fe   : > { %s1499_s0 = scalar_lea.vmem %s2016_s19, 512  ;;  %s1629_s1 = smov [#allocation12]  }
 0x4ff   : > { %p1500_p2 = scmp.ne.s32.totalorder %s2016_s19, %s1499_s0  ;;  %s1503_s14 = sshll.u32 %s1629_s1, 4  ;;  %s1504_s14 = int_to_ptr.vmem [resolvable:$false] %s1503_s14 }
 0x500   : > { %s1505_s25 = scalar_lea.vmem %s1504_s14, 1024  ;;  %p1506_p10 = scmp.lt.s32.totalorder %s2016_s19, %s1504_s14 }
 0x501   : > { %p1501_p13 = pnand %p1500_p2, %p2123_p0  ;;  %p1507_p4 = scmp.lt.s32.totalorder %s1505_s25, %s1499_s0 }
 0x503   : > { %p1502_p6 = pneg %p1501_p13  ;;  %p1508_p5 = por %p1507_p4, %p1506_p10 }
 0x505   : > { %p1509_p8 = pnand %p1508_p5, %p1502_p6 }
 0x507   : > { %1512 = shalt.err (!%p1509_p8)
}
 0x508   : > { %s1513_s27 = scalar_lea.hbm %s2014_s13, 512  ;;  %s1517_s26 = scalar_lea.hbm %s2103_s6, 1024 }
 0x509   : > { %p1514_p11 = scmp.ne.s32.totalorder %s2014_s13, %s1513_s27  ;;  %p1518_p7 = scmp.lt.u32.totalorder %s2014_s13, %s2103_s6 }
 0x50a   : > { %p1519_p9 = scmp.lt.u32.totalorder %s1517_s26, %s1513_s27  ;;  %p1521_p2 = scmp.lt.u32.totalorder %s1513_s27, %s2014_s13 }
 0x50b   : > { %p1515_p1 = pnand %p1514_p11, %p2123_p0 }
 0x50c   : > { %p1520_p12 = por %p1519_p9, %p1518_p7 }
 0x50d   : > { %p1516_p3 = pneg %p1515_p1 }
 0x50e   : > { %p1522_p13 = por %p1521_p2, %p1520_p12 }
 0x510   : > { %p1523_p6 = pnand %p1522_p13, %p1516_p3 }
 0x512   : > { %1526 = shalt.err (!%p1523_p6)
}
 0x513   : > { %s1630_s18 = smov 128   ;;  %s2124_s9 = smov 8   ;;  %v844_v37 = vpop.f32.mrb[16].mxu0  ;;  %vm863_vm4 = vcmask 130048   ;;  %vm865_vm5 = vcmask 195584  }
 0x514   : > { %1251 = dma.vmem_to_hbm [thread:$0]  (%p2123_p0), %s2016_s19, 512, %s2014_s13, %s884_s15, %s1630_s18, %s1630_s18, %s2124_s9   ;;  %v1236_v38 = vpop.f32.mrb[17].mxu0 }
 0x515   : > { %s1631_s0 = smov 24   ;;  %v847_v39 = vpop.f32.mrb[18].mxu0  ;;  %s300_s1 = scalar_lea.vmem [#allocation8], %s1843_s10 }
 0x516   : > { %859 = vrot.lane.b32.xlu1 %v844_v37, %s1631_s0  ;;  %v1237_v40 = vpop.f32.mrb[19].mxu0  ;;  %s897_s14 = sshll.u32 %s300_s1, 4  ;;  %s2050_s15 = scalar_lea.hbm %s2100_s3, %s1952_s20  ;;  %s2052_s14 = int_to_ptr.vmem [resolvable:$true] %s897_s14 }
 0x517   : > { %s869_s10 = scalar_lea.sflag [#allocation4], %s1840_s8  ;;  %s1527_s25 = scalar_lea.vmem %s2052_s14, 128 }
 0x518   : > { %p1528_p10 = scmp.ne.s32.totalorder %s2052_s14, %s1527_s25  ;;  %s1632_s27 = smov [#allocation8]  }
 0x519   : > { %s1531_s16 = sshll.u32 %s1632_s27, 4  ;;  %s1532_s16 = int_to_ptr.vmem [resolvable:$false] %s1531_s16 }
 0x51a   : > { %p1529_p4 = pnand %p1528_p10, %p2123_p0  ;;  %s1533_s17 = scalar_lea.vmem %s1532_s16, 256 }
 0x51b   : > { %p1534_p8 = scmp.lt.s32.totalorder %s2052_s14, %s1532_s16  ;;  %p1535_p11 = scmp.lt.s32.totalorder %s1533_s17, %s1527_s25 }
 0x51c   : > { %p1530_p5 = pneg %p1529_p4 }
 0x51d   : > { %p1536_p1 = por %p1535_p11, %p1534_p8 }
 0x51f   : > { %p1537_p3 = pnand %p1536_p1, %p1530_p5 }
 0x539   : > { %v852_v41 = vpop.permute.xlu1 %851 }
 0x53a   : > { %v862_v43 = vsel %vm405_vm2, %v1947_v26, %v852_v41 }
 0x55e   : > { %v856_v42 = vpop.permute.xlu0 %855 }
 0x55f   : > { %v864_v44 = vsel %vm863_vm4, %v862_v43, %v856_v42 }
 0x588   : > { %v860_v45 = vpop.permute.xlu1 %859 }
 0x589   : > { %v866_v46 = vsel %vm865_vm5, %v864_v44, %v860_v45 }
 0x58a   : > { %867 = vst.msk [vmem:[%s300_s1] sm:$0xff] %vm348_vm1, %v866_v46 }
 0x58b   : > { %1540 = shalt.err (!%p1537_p3)
}
 0x58c   : > { %s1541_s8 = scalar_lea.hbm %s2050_s15, 128  ;;  %s1545_s7 = scalar_lea.hbm %s2100_s3, 256 }
 0x58d   : > { %p1542_p7 = scmp.ne.s32.totalorder %s2050_s15, %s1541_s8  ;;  %p1546_p2 = scmp.lt.u32.totalorder %s2050_s15, %s2100_s3 }
 0x58e   : > { %p1547_p13 = scmp.lt.u32.totalorder %s1545_s7, %s1541_s8  ;;  %p1549_p10 = scmp.lt.u32.totalorder %s1541_s8, %s2050_s15 }
 0x58f   : > { %p1543_p9 = pnand %p1542_p7, %p2123_p0 }
 0x590   : > { %p1548_p6 = por %p1547_p13, %p1546_p2 }
 0x591   : > { %p1544_p12 = pneg %p1543_p9 }
 0x592   : > { %p1550_p4 = por %p1549_p10, %p1548_p6 }
 0x594   : > { %p1551_p5 = pnand %p1550_p4, %p1544_p12 }
 0x596   : > { %1554 = shalt.err (!%p1551_p5)
}
 0x597   : > { %1248 = dma.vmem_to_hbm [thread:$0]  (%p2123_p0), %s2052_s14, 128, %s2050_s15, %s869_s10  }
 0x598 PF: > { %s951_s9 = sand.u32 1, %s1593_s21   ;;  %p2125_p8 = scmp.ne.s32.totalorder %s2112_s28, 0 }
 0x599   : > { %p2126_p11 = scmp.ge.s32.totalorder %s1605_s24, 2  ;;  %s952_s0 = scalar_lea.sflag [#allocation4], %s951_s9 }
 0x59b   : > { %p1268_p1 = pnand %p2126_p11, %p2125_p8 }
 0x59d   : > { %1580 = dma.done.wait (!%p1268_p1), %s952_s0, 128  }
 0x59e   : > { %1582 = vsyncadd (!%p1268_p1), %s952_s0, 4294967168  ;;  %s2127_s1 = sadd.s32 4294967294, %s1605_s24  }
 0x59f   : > { %s960_s19 = sand.u32 1, %s2127_s1  }
 0x5a0   : > { %s961_s13 = scalar_lea.sflag [#allocation10], %s960_s19 }
 0x5a1   : > { %1584 = dma.done.wait (!%p1268_p1), %s961_s13, 256  }
 0x5a2   : > { %1586 = vsyncadd (!%p1268_p1), %s961_s13, 4294967040  ;;  %s979_s11 = scalar_lea.sflag [#allocation13], %s951_s9 }
 0x5a3   : > { %1588 = dma.done.wait (!%p1268_p1), %s979_s11, 512  }
 0x5a4   : > { %1590 = vsyncadd (!%p1268_p1), %s979_s11, 4294966784  ;;  %p27_p0 = scmp.ge.s32.totalorder %s1781_s30, 4   ;;  %s2128_s21 = smov %s1597_s22 }
 0x5a5   : > { %s2129_s22 = smov %s1601_s23  ;;  %s2130_s23 = smov %s1797_s12 }
 0x5a6   : > { %s2131_s24 = smov %s1781_s30  ;;  %29 = sbr.rel (!%p27_p0) target bundleno = 13 (0xd), region = 137 }
 0x5ad   :  { %984 = vsyncpa [#allocation3], 1 }
 0x5ae   :  { %986 = vsyncpa [#allocation3 + $0x1], 1 }
 0x5af   :  { %987 = vsyncpa [#allocation6], 1 }
 0x5b0   :  { %988 = vsyncpa [#allocation4], 1 }
 0x5b1   :  { %990 = vsyncpa [#allocation4 + $0x1], 1 }
 0x5b2   :  { %991 = vsyncpa [#allocation10], 1 }
 0x5b3   :  { %993 = vsyncpa [#allocation10 + $0x1], 1 }
 0x5b4   :  { %994 = vsyncpa [#allocation13], 1 }
 0x5b5   :  { %996 = vsyncpa [#allocation13 + $0x1], 1 }

</bundles_post_ra>
